<compile_context>
chip_gen: v6e
topology: v6e:2x2x1
jax: 0.10.0
libtpu: 0.0.40
codegen_flags: <defaults>
</compile_context>

<pallas_src>
import functools

import jax
import jax.numpy as jnp
from jax.experimental import pallas as pl
from jax.experimental.pallas import tpu as pltpu


_IN_ROWS = 30     # input slab rows:  [o1(5) | o2(5) | o3(5) | a1(5) | a2(5) | a3(5)]
_OUT_ROWS = 22    # output slab rows: [loss(11) | out(11)]
_LANE = 128
_PALLAS_MIN_BATCH = 1024  # below this, let XLA fuse the pure-JAX path


def _round_up(x, m):
    return (x + m - 1) // m * m


def _l1_test_loss_kernel(x_ref, y_ref):
    """Feature-major kernel.

    x_ref : (30, TB) f32  -- [o1|o2|o3|a1|a2|a3] stacked on sublanes, batch on lanes
    y_ref : (22, TB) f32  -- rows 0:11 = loss, rows 11:22 = out

    Every statement is an independent (ref-slice -> compute -> store) chain so
    Mosaic can strip-mine load->compute->store per vreg; nothing block-wide is
    held live across statements (no spills at large TB).
    """
    third = 1.0 / 3.0

    # out: area (rows 11:13) = (o1[3:5] + o2[3:5] + o3[3:5]) / 3
    y_ref[11:13, :] = (x_ref[3:5, :] + x_ref[8:10, :] + x_ref[13:15, :]) * third

    # loss: arealoss (rows 0:2) = |area - a1[3:5]|.  `area` is recomputed here on
    # purpose: a reused (2, block_b) value would be ~block_b/128 live vregs.
    y_ref[0:2, :] = jnp.abs(
        (x_ref[3:5, :] + x_ref[8:10, :] + x_ref[13:15, :]) * third - x_ref[18:20, :])

    # loss: dimsloss (rows 2:5) = [|a1[0]-o1[0]|, |a2[0]-o2[0]|, |a3[0]-o3[0]|]
    y_ref[2:3, :] = jnp.abs(x_ref[15:16, :] - x_ref[0:1, :])
    y_ref[3:4, :] = jnp.abs(x_ref[20:21, :] - x_ref[5:6, :])
    y_ref[4:5, :] = jnp.abs(x_ref[25:26, :] - x_ref[10:11, :])

    # loss: rwtloss (rows 5:11) = [|a1[1:3]-o1[1:3]|, |a2[1:3]-o2[1:3]|, |a3[1:3]-o3[1:3]|]
    y_ref[5:7, :] = jnp.abs(x_ref[16:18, :] - x_ref[1:3, :])
    y_ref[7:9, :] = jnp.abs(x_ref[21:23, :] - x_ref[6:8, :])
    y_ref[9:11, :] = jnp.abs(x_ref[26:28, :] - x_ref[11:13, :])

    # out: dims (rows 13:16) = [o3[0], o1[0], o2[0]]
    y_ref[13:14, :] = x_ref[10:11, :]
    y_ref[14:15, :] = x_ref[0:1, :]
    y_ref[15:16, :] = x_ref[5:6, :]

    # out: rwt (rows 16:22) = [o1[1:3], o2[1:3], o3[1:3]]
    y_ref[16:18, :] = x_ref[1:3, :]
    y_ref[18:20, :] = x_ref[6:8, :]
    y_ref[20:22, :] = x_ref[11:13, :]


def _fused_jax(o1, o2, o3, a1, a2, a3):
    """Pure-JAX path for small batches (XLA fuses this; no kernel launch)."""
    d1 = jnp.abs(a1 - o1)
    d2 = jnp.abs(a2 - o2)
    d3 = jnp.abs(a3 - o3)
    area = (o1[:, 3:5] + o2[:, 3:5] + o3[:, 3:5]) / 3.0
    rwt = jnp.concatenate((o1[:, 1:3], o2[:, 1:3], o3[:, 1:3]), axis=1)
    dims = jnp.concatenate((o3[:, 0:1], o1[:, 0:1], o2[:, 0:1]), axis=1)
    out = jnp.concatenate((area, dims, rwt), axis=1)
    arealoss = jnp.abs(area - a1[:, 3:5])
    rwtloss = jnp.concatenate((d1[:, 1:3], d2[:, 1:3], d3[:, 1:3]), axis=1)
    dimsloss = jnp.concatenate((d1[:, 0:1], d2[:, 0:1], d3[:, 0:1]), axis=1)
    loss = jnp.concatenate((arealoss, dimsloss, rwtloss), axis=1)
    return loss, out


def _choose_block(batch, block_b):
    """Lane-block (multiple of 128) capped so tiny batches aren't over-padded
    and grid_b stays >= 2 when there is enough work (v7x megacore sharding)."""
    b128 = _round_up(batch, _LANE)
    eff = min(_round_up(block_b, _LANE), b128)
    if b128 >= 2 * _LANE:
        eff = min(eff, _round_up(pl.cdiv(b128, 2), _LANE))
    return max(eff, _LANE)


@functools.partial(jax.jit, static_argnames=("force_pallas", "block_b"))
def l1_test_loss(outd1, outd2, outd3, label, d1annot, d2annot, d3annot,
                 *, force_pallas=False, block_b=8192):
    # axis=-1 squeeze: identical to torch .squeeze() for B > 1, and stays
    # correct for B == 1 (torch would collapse to (5,) and break).
    a1 = jnp.squeeze(d1annot, axis=-1)
    a2 = jnp.squeeze(d2annot, axis=-1)
    a3 = jnp.squeeze(d3annot, axis=-1)
    label = jnp.reshape(label, (-1, 11))

    B = outd1.shape[0]
    dt = outd1.dtype

    if B < _PALLAS_MIN_BATCH and not force_pallas:
        loss, out = _fused_jax(outd1, outd2, outd3, a1, a2, a3)
        return loss, out, label

    eff_bb = _choose_block(B, block_b)
    grid_b = pl.cdiv(B, eff_bb)
    b_padded = grid_b * eff_bb

    # Single input slab: concat + (pad folded in BEFORE the transpose) + one
    # transpose copy.  Batch lives on the 128-lane axis inside the kernel.
    stacked = jnp.concatenate((outd1, outd2, outd3, a1, a2, a3), axis=1)  # (B, 30)
    if b_padded != B:
        stacked = jnp.pad(stacked, ((0, b_padded - B), (0, 0)))
    x_slab = stacked.T                                                    # (30, Bp)

    itemsize = jnp.dtype(dt).itemsize
    vmem_limit = int(min(64 * 1024 * 1024,
                         max(32 * 1024 * 1024,
                             4 * (_IN_ROWS + _OUT_ROWS) * eff_bb * itemsize)))

    y_slab = pl.pallas_call(
        _l1_test_loss_kernel,
        out_shape=jax.ShapeDtypeStruct((_OUT_ROWS, b_padded), dt),
        grid=(grid_b,),
        in_specs=[pl.BlockSpec((_IN_ROWS, eff_bb), lambda i: (0, i))],
        out_specs=pl.BlockSpec((_OUT_ROWS, eff_bb), lambda i: (0, i)),
        compiler_params=pltpu.CompilerParams(
            dimension_semantics=("parallel",),       # shard batch over 2 TCs on v7x
            vmem_limit_bytes=vmem_limit),
    )(x_slab)

    # Slice + transpose back to batch-major (fused by XLA into one copy each).
    loss = y_slab[0:11, :B].T
    out = y_slab[11:22, :B].T
    return loss, out, label


def _reference(outd1, outd2, outd3, label, d1annot, d2annot, d3annot):
    a1 = jnp.squeeze(d1annot, axis=-1)
    a2 = jnp.squeeze(d2annot, axis=-1)
    a3 = jnp.squeeze(d3annot, axis=-1)
    label = jnp.reshape(label, (-1, 11))
    loss, out = _fused_jax(outd1, outd2, outd3, a1, a2, a3)
    return loss, out, label


def _make_inputs(batch, key):
    ks = jax.random.split(key, 7)
    outd1 = jax.random.normal(ks[0], (batch, 5), dtype=jnp.float32)
    outd2 = jax.random.normal(ks[1], (batch, 5), dtype=jnp.float32)
    outd3 = jax.random.normal(ks[2], (batch, 5), dtype=jnp.float32)
    label = jax.random.normal(ks[3], (batch, 11), dtype=jnp.float32)
    d1annot = jax.random.normal(ks[4], (batch, 5, 1), dtype=jnp.float32)
    d2annot = jax.random.normal(ks[5], (batch, 5, 1), dtype=jnp.float32)
    d3annot = jax.random.normal(ks[6], (batch, 5, 1), dtype=jnp.float32)
    return outd1, outd2, outd3, label, d1annot, d2annot, d3annot


def _check(got, ref):
    for g, r in zip(got, ref):
        assert g.shape == r.shape, (g.shape, r.shape)
        assert jnp.allclose(g, r, atol=1e-6)


if __name__ == "__main__":
    key = jax.random.PRNGKey(0)

    # Case 1: tiny batch, Pallas path forced (single grid step, lane padding 8->128).
    args = _make_inputs(8, jax.random.fold_in(key, 0))
    got = l1_test_loss(*args, force_pallas=True, block_b=128)
    jax.block_until_ready(got)
    _check(got, _reference(*args))

    # Case 2: batch not divisible by block -> multi-step grid + fused tail padding.
    args = _make_inputs(300, jax.random.fold_in(key, 1))
    got = l1_test_loss(*args, force_pallas=True, block_b=128)
    jax.block_until_ready(got)
    _check(got, _reference(*args))

    # Case 3: default dispatch for small batch takes the fused XLA path.
    args = _make_inputs(4, jax.random.fold_in(key, 2))
    got = l1_test_loss(*args)
    jax.block_until_ready(got)
    _check(got, _reference(*args))

    print("KERNEL_OK")
</pallas_src>

<mosaic_0001>
module attributes {stable_mosaic.version = 11 : i64} {
  func.func @_l1_test_loss_kernel(%arg0: i32, %arg1: memref<30x128xf32, #tpu.memory_space<vmem>>, %arg2: memref<22x128xf32, #tpu.memory_space<vmem>>) attributes {dimension_semantics = [#tpu.dimension_semantics<parallel>], iteration_bounds = array<i64: 1>, scalar_prefetch = 0 : i64, scratch_operands = 0 : i64, tpu.core_type = #tpu.core_type<tc>, window_params = [{transform_indices = @transform_0, window_bounds = array<i64: 30, 128>}, {transform_indices = @transform_1, window_bounds = array<i64: 22, 128>}]} {
    %c3 = arith.constant 3 : index
    %c0 = arith.constant 0 : index
    %0 = vector.load %arg1[%c3, %c0] : memref<30x128xf32, #tpu.memory_space<vmem>>, vector<2x128xf32>
    %c8 = arith.constant 8 : index
    %c0_0 = arith.constant 0 : index
    %1 = vector.load %arg1[%c8, %c0_0] : memref<30x128xf32, #tpu.memory_space<vmem>>, vector<2x128xf32>
    %2 = arith.addf %0, %1 : vector<2x128xf32>
    %c13 = arith.constant 13 : index
    %c0_1 = arith.constant 0 : index
    %3 = vector.load %arg1[%c13, %c0_1] : memref<30x128xf32, #tpu.memory_space<vmem>>, vector<2x128xf32>
    %4 = arith.addf %2, %3 : vector<2x128xf32>
    %cst = arith.constant 0.333333343 : f32
    %5 = vector.broadcast %cst : f32 to vector<2x128xf32>
    %6 = arith.mulf %4, %5 : vector<2x128xf32>
    %c11 = arith.constant 11 : index
    %c0_2 = arith.constant 0 : index
    %7 = vector.load %arg2[%c11, %c0_2] : memref<22x128xf32, #tpu.memory_space<vmem>>, vector<2x128xf32>
    tpu.vector_store %arg2[%c11, %c0_2], %6 {strides = array<i32>} : memref<22x128xf32, #tpu.memory_space<vmem>>, vector<2x128xf32>,
    %c3_3 = arith.constant 3 : index
    %c0_4 = arith.constant 0 : index
    %8 = vector.load %arg1[%c3_3, %c0_4] : memref<30x128xf32, #tpu.memory_space<vmem>>, vector<2x128xf32>
    %c8_5 = arith.constant 8 : index
    %c0_6 = arith.constant 0 : index
    %9 = vector.load %arg1[%c8_5, %c0_6] : memref<30x128xf32, #tpu.memory_space<vmem>>, vector<2x128xf32>
    %10 = arith.addf %8, %9 : vector<2x128xf32>
    %c13_7 = arith.constant 13 : index
    %c0_8 = arith.constant 0 : index
    %11 = vector.load %arg1[%c13_7, %c0_8] : memref<30x128xf32, #tpu.memory_space<vmem>>, vector<2x128xf32>
    %12 = arith.addf %10, %11 : vector<2x128xf32>
    %cst_9 = arith.constant 0.333333343 : f32
    %13 = vector.broadcast %cst_9 : f32 to vector<2x128xf32>
    %14 = arith.mulf %12, %13 : vector<2x128xf32>
    %c18 = arith.constant 18 : index
    %c0_10 = arith.constant 0 : index
    %15 = vector.load %arg1[%c18, %c0_10] : memref<30x128xf32, #tpu.memory_space<vmem>>, vector<2x128xf32>
    %16 = arith.subf %14, %15 : vector<2x128xf32>
    %17 = math.absf %16 : vector<2x128xf32>
    %c0_11 = arith.constant 0 : index
    %c0_12 = arith.constant 0 : index
    %18 = vector.load %arg2[%c0_11, %c0_12] : memref<22x128xf32, #tpu.memory_space<vmem>>, vector<2x128xf32>
    tpu.vector_store %arg2[%c0_11, %c0_12], %17 {strides = array<i32>} : memref<22x128xf32, #tpu.memory_space<vmem>>, vector<2x128xf32>,
    %c15 = arith.constant 15 : index
    %c0_13 = arith.constant 0 : index
    %19 = vector.load %arg1[%c15, %c0_13] : memref<30x128xf32, #tpu.memory_space<vmem>>, vector<1x128xf32>
    %c0_14 = arith.constant 0 : index
    %c0_15 = arith.constant 0 : index
    %20 = vector.load %arg1[%c0_14, %c0_15] : memref<30x128xf32, #tpu.memory_space<vmem>>, vector<1x128xf32>
    %21 = arith.subf %19, %20 : vector<1x128xf32>
    %22 = math.absf %21 : vector<1x128xf32>
    %c2 = arith.constant 2 : index
    %c0_16 = arith.constant 0 : index
    %23 = vector.load %arg2[%c2, %c0_16] : memref<22x128xf32, #tpu.memory_space<vmem>>, vector<1x128xf32>
    tpu.vector_store %arg2[%c2, %c0_16], %22 {strides = array<i32>} : memref<22x128xf32, #tpu.memory_space<vmem>>, vector<1x128xf32>,
    %c20 = arith.constant 20 : index
    %c0_17 = arith.constant 0 : index
    %24 = vector.load %arg1[%c20, %c0_17] : memref<30x128xf32, #tpu.memory_space<vmem>>, vector<1x128xf32>
    %c5 = arith.constant 5 : index
    %c0_18 = arith.constant 0 : index
    %25 = vector.load %arg1[%c5, %c0_18] : memref<30x128xf32, #tpu.memory_space<vmem>>, vector<1x128xf32>
    %26 = arith.subf %24, %25 : vector<1x128xf32>
    %27 = math.absf %26 : vector<1x128xf32>
    %c3_19 = arith.constant 3 : index
    %c0_20 = arith.constant 0 : index
    %28 = vector.load %arg2[%c3_19, %c0_20] : memref<22x128xf32, #tpu.memory_space<vmem>>, vector<1x128xf32>
    tpu.vector_store %arg2[%c3_19, %c0_20], %27 {strides = array<i32>} : memref<22x128xf32, #tpu.memory_space<vmem>>, vector<1x128xf32>,
    %c25 = arith.constant 25 : index
    %c0_21 = arith.constant 0 : index
    %29 = vector.load %arg1[%c25, %c0_21] : memref<30x128xf32, #tpu.memory_space<vmem>>, vector<1x128xf32>
    %c10 = arith.constant 10 : index
    %c0_22 = arith.constant 0 : index
    %30 = vector.load %arg1[%c10, %c0_22] : memref<30x128xf32, #tpu.memory_space<vmem>>, vector<1x128xf32>
    %31 = arith.subf %29, %30 : vector<1x128xf32>
    %32 = math.absf %31 : vector<1x128xf32>
    %c4 = arith.constant 4 : index
    %c0_23 = arith.constant 0 : index
    %33 = vector.load %arg2[%c4, %c0_23] : memref<22x128xf32, #tpu.memory_space<vmem>>, vector<1x128xf32>
    tpu.vector_store %arg2[%c4, %c0_23], %32 {strides = array<i32>} : memref<22x128xf32, #tpu.memory_space<vmem>>, vector<1x128xf32>,
    %c16 = arith.constant 16 : index
    %c0_24 = arith.constant 0 : index
    %34 = vector.load %arg1[%c16, %c0_24] : memref<30x128xf32, #tpu.memory_space<vmem>>, vector<2x128xf32>
    %c1 = arith.constant 1 : index
    %c0_25 = arith.constant 0 : index
    %35 = vector.load %arg1[%c1, %c0_25] : memref<30x128xf32, #tpu.memory_space<vmem>>, vector<2x128xf32>
    %36 = arith.subf %34, %35 : vector<2x128xf32>
    %37 = math.absf %36 : vector<2x128xf32>
    %c5_26 = arith.constant 5 : index
    %c0_27 = arith.constant 0 : index
    %38 = vector.load %arg2[%c5_26, %c0_27] : memref<22x128xf32, #tpu.memory_space<vmem>>, vector<2x128xf32>
    tpu.vector_store %arg2[%c5_26, %c0_27], %37 {strides = array<i32>} : memref<22x128xf32, #tpu.memory_space<vmem>>, vector<2x128xf32>,
    %c21 = arith.constant 21 : index
    %c0_28 = arith.constant 0 : index
    %39 = vector.load %arg1[%c21, %c0_28] : memref<30x128xf32, #tpu.memory_space<vmem>>, vector<2x128xf32>
    %c6 = arith.constant 6 : index
    %c0_29 = arith.constant 0 : index
    %40 = vector.load %arg1[%c6, %c0_29] : memref<30x128xf32, #tpu.memory_space<vmem>>, vector<2x128xf32>
    %41 = arith.subf %39, %40 : vector<2x128xf32>
    %42 = math.absf %41 : vector<2x128xf32>
    %c7 = arith.constant 7 : index
    %c0_30 = arith.constant 0 : index
    %43 = vector.load %arg2[%c7, %c0_30] : memref<22x128xf32, #tpu.memory_space<vmem>>, vector<2x128xf32>
    tpu.vector_store %arg2[%c7, %c0_30], %42 {strides = array<i32>} : memref<22x128xf32, #tpu.memory_space<vmem>>, vector<2x128xf32>,
    %c26 = arith.constant 26 : index
    %c0_31 = arith.constant 0 : index
    %44 = vector.load %arg1[%c26, %c0_31] : memref<30x128xf32, #tpu.memory_space<vmem>>, vector<2x128xf32>
    %c11_32 = arith.constant 11 : index
    %c0_33 = arith.constant 0 : index
    %45 = vector.load %arg1[%c11_32, %c0_33] : memref<30x128xf32, #tpu.memory_space<vmem>>, vector<2x128xf32>
    %46 = arith.subf %44, %45 : vector<2x128xf32>
    %47 = math.absf %46 : vector<2x128xf32>
    %c9 = arith.constant 9 : index
    %c0_34 = arith.constant 0 : index
    %48 = vector.load %arg2[%c9, %c0_34] : memref<22x128xf32, #tpu.memory_space<vmem>>, vector<2x128xf32>
    tpu.vector_store %arg2[%c9, %c0_34], %47 {strides = array<i32>} : memref<22x128xf32, #tpu.memory_space<vmem>>, vector<2x128xf32>,
    %c10_35 = arith.constant 10 : index
    %c0_36 = arith.constant 0 : index
    %49 = vector.load %arg1[%c10_35, %c0_36] : memref<30x128xf32, #tpu.memory_space<vmem>>, vector<1x128xf32>
    %c13_37 = arith.constant 13 : index
    %c0_38 = arith.constant 0 : index
    %50 = vector.load %arg2[%c13_37, %c0_38] : memref<22x128xf32, #tpu.memory_space<vmem>>, vector<1x128xf32>
    tpu.vector_store %arg2[%c13_37, %c0_38], %49 {strides = array<i32>} : memref<22x128xf32, #tpu.memory_space<vmem>>, vector<1x128xf32>,
    %c0_39 = arith.constant 0 : index
    %c0_40 = arith.constant 0 : index
    %51 = vector.load %arg1[%c0_39, %c0_40] : memref<30x128xf32, #tpu.memory_space<vmem>>, vector<1x128xf32>
    %c14 = arith.constant 14 : index
    %c0_41 = arith.constant 0 : index
    %52 = vector.load %arg2[%c14, %c0_41] : memref<22x128xf32, #tpu.memory_space<vmem>>, vector<1x128xf32>
    tpu.vector_store %arg2[%c14, %c0_41], %51 {strides = array<i32>} : memref<22x128xf32, #tpu.memory_space<vmem>>, vector<1x128xf32>,
    %c5_42 = arith.constant 5 : index
    %c0_43 = arith.constant 0 : index
    %53 = vector.load %arg1[%c5_42, %c0_43] : memref<30x128xf32, #tpu.memory_space<vmem>>, vector<1x128xf32>
    %c15_44 = arith.constant 15 : index
    %c0_45 = arith.constant 0 : index
    %54 = vector.load %arg2[%c15_44, %c0_45] : memref<22x128xf32, #tpu.memory_space<vmem>>, vector<1x128xf32>
    tpu.vector_store %arg2[%c15_44, %c0_45], %53 {strides = array<i32>} : memref<22x128xf32, #tpu.memory_space<vmem>>, vector<1x128xf32>,
    %c1_46 = arith.constant 1 : index
    %c0_47 = arith.constant 0 : index
    %55 = vector.load %arg1[%c1_46, %c0_47] : memref<30x128xf32, #tpu.memory_space<vmem>>, vector<2x128xf32>
    %c16_48 = arith.constant 16 : index
    %c0_49 = arith.constant 0 : index
    %56 = vector.load %arg2[%c16_48, %c0_49] : memref<22x128xf32, #tpu.memory_space<vmem>>, vector<2x128xf32>
    tpu.vector_store %arg2[%c16_48, %c0_49], %55 {strides = array<i32>} : memref<22x128xf32, #tpu.memory_space<vmem>>, vector<2x128xf32>,
    %c6_50 = arith.constant 6 : index
    %c0_51 = arith.constant 0 : index
    %57 = vector.load %arg1[%c6_50, %c0_51] : memref<30x128xf32, #tpu.memory_space<vmem>>, vector<2x128xf32>
    %c18_52 = arith.constant 18 : index
    %c0_53 = arith.constant 0 : index
    %58 = vector.load %arg2[%c18_52, %c0_53] : memref<22x128xf32, #tpu.memory_space<vmem>>, vector<2x128xf32>
    tpu.vector_store %arg2[%c18_52, %c0_53], %57 {strides = array<i32>} : memref<22x128xf32, #tpu.memory_space<vmem>>, vector<2x128xf32>,
    %c11_54 = arith.constant 11 : index
    %c0_55 = arith.constant 0 : index
    %59 = vector.load %arg1[%c11_54, %c0_55] : memref<30x128xf32, #tpu.memory_space<vmem>>, vector<2x128xf32>
    %c20_56 = arith.constant 20 : index
    %c0_57 = arith.constant 0 : index
    %60 = vector.load %arg2[%c20_56, %c0_57] : memref<22x128xf32, #tpu.memory_space<vmem>>, vector<2x128xf32>
    tpu.vector_store %arg2[%c20_56, %c0_57], %59 {strides = array<i32>} : memref<22x128xf32, #tpu.memory_space<vmem>>, vector<2x128xf32>,
    return
  }
  func.func @transform_0(%arg0: i32) -> (i32, i32) {
    %c0_i32 = arith.constant 0 : i32
    %c0_i32_0 = arith.constant 0 : i32
    return %c0_i32, %arg0 : i32, i32
  }
  func.func @transform_1(%arg0: i32) -> (i32, i32) {
    %c0_i32 = arith.constant 0 : i32
    %c0_i32_0 = arith.constant 0 : i32
    return %c0_i32, %arg0 : i32, i32
  }
}

</mosaic_0001>

<bundles_post_ra>
// kernel: l1_test_loss.1
= control target key start
LH: loop header
LB: loop body
LE: loop exit
PB: predicated region body
PF: predicated region fallthrough
CT: control target
= control target key end

     0   :  { %s198_s0 = inlined_call_operand.vmem [shape: f32[30,128], index: 0, kind: input, shape index: {}]   ;;  %s199_s1 = inlined_call_operand.vmem [shape: f32[22,128], index: 1, kind: output, shape index: {}]  }
   0x1   :  { %v8_v0 = vld [vmem:[%s198_s0 + $0x3] sm:$0x3]  ;;  %v9_v1 = vld [vmem:[%s198_s0 + $0x8] sm:$0x3]  ;;  %v11_v2 = vld [vmem:[%s198_s0 + $0xd] sm:$0x3] }
   0x2   :  { %v10_v3 = vadd.f32 %v9_v1, %v8_v0  ;;  %v15_v4 = vld [vmem:[%s198_s0 + $0x3] sm:$0x3]  ;;  %v16_v5 = vld [vmem:[%s198_s0 + $0x8] sm:$0x3]  ;;  %v18_v6 = vld [vmem:[%s198_s0 + $0xd] sm:$0x3] }
   0x3   :  { %v17_v7 = vadd.f32 %v16_v5, %v15_v4  ;;  %v25_v8 = vld [vmem:[%s198_s0 + $0xf] sm:$0x1]  ;;  %v26_v9 = vld [vmem:[%s198_s0] sm:$0x1]  ;;  %v21_v11 = vld [vmem:[%s198_s0 + $0x12] sm:$0x3] }
   0x4   :  { %v12_v10 = vadd.f32 %v11_v2, %v10_v3  ;;  %v27_v12 = vsub.f32 %v25_v8, %v26_v9  ;;  %v30_v13 = vld [vmem:[%s198_s0 + $0x14] sm:$0x1]  ;;  %v31_v14 = vld [vmem:[%s198_s0 + $0x5] sm:$0x1]  ;;  %v35_v15 = vld [vmem:[%s198_s0 + $0x19] sm:$0x1] }
   0x5   :  { %v19_v16 = vadd.f32 %v18_v6, %v17_v7  ;;  %v32_v17 = vsub.f32 %v30_v13, %v31_v14  ;;  %v36_v18 = vld [vmem:[%s198_s0 + $0xa] sm:$0x1]  ;;  %v40_v19 = vld [vmem:[%s198_s0 + $0x10] sm:$0x3]  ;;  %v41_v20 = vld [vmem:[%s198_s0 + $0x1] sm:$0x3] }
   0x6   :  { %v13_v21 = vmul.f32 0.33333334, %v12_v10  ;;  %v28_v22 = vand.u32 2147483647, %v27_v12  ;;  %v37_v23 = vsub.f32 %v35_v15, %v36_v18  ;;  %v42_v24 = vsub.f32 %v40_v19, %v41_v20  ;;  %v45_v25 = vld [vmem:[%s198_s0 + $0x15] sm:$0x3] }
   0x7   :  { %v20_v26 = vmul.f32 0.33333334, %v19_v16  ;;  %v33_v27 = vand.u32 2147483647, %v32_v17  ;;  %v46_v28 = vld [vmem:[%s198_s0 + $0x6] sm:$0x3] }
   0x8   :  { %14 = vst [vmem:[%s199_s1 + $0xb] sm:$0x3] %v13_v21  ;;  %29 = vst [vmem:[%s199_s1 + $0x2] sm:$0x1] %v28_v22  ;;  %v38_v29 = vand.u32 2147483647, %v37_v23  ;;  %v47_v31 = vsub.f32 %v45_v25, %v46_v28 }
   0x9   :  { %v43_v30 = vand.u32 2147483647, %v42_v24  ;;  %v50_v32 = vld [vmem:[%s198_s0 + $0x1a] sm:$0x3]  ;;  %v22_v33 = vsub.f32 %v20_v26, %v21_v11  ;;  %34 = vst [vmem:[%s199_s1 + $0x3] sm:$0x1] %v33_v27 }
   0xa   :  { %v51_v34 = vld [vmem:[%s198_s0 + $0xb] sm:$0x3]  ;;  %v55_v35 = vld [vmem:[%s198_s0 + $0xa] sm:$0x1]  ;;  %v57_v36 = vld [vmem:[%s198_s0] sm:$0x1] }
   0xb   :  { %39 = vst [vmem:[%s199_s1 + $0x4] sm:$0x1] %v38_v29  ;;  %44 = vst [vmem:[%s199_s1 + $0x5] sm:$0x3] %v43_v30  ;;  %v48_v37 = vand.u32 2147483647, %v47_v31  ;;  %v52_v38 = vsub.f32 %v50_v32, %v51_v34 }
   0xc   :  { %56 = vst [vmem:[%s199_s1 + $0xd] sm:$0x1] %v55_v35  ;;  %58 = vst [vmem:[%s199_s1 + $0xe] sm:$0x1] %v57_v36  ;;  %v59_v39 = vld [vmem:[%s198_s0 + $0x5] sm:$0x1] }
   0xd   :  { %v61_v40 = vld [vmem:[%s198_s0 + $0x1] sm:$0x3]  ;;  %v23_v41 = vand.u32 2147483647, %v22_v33  ;;  %60 = vst [vmem:[%s199_s1 + $0xf] sm:$0x1] %v59_v39 }
   0xe   :  { %62 = vst [vmem:[%s199_s1 + $0x10] sm:$0x3] %v61_v40  ;;  %v63_v42 = vld [vmem:[%s198_s0 + $0x6] sm:$0x3]  ;;  %v65_v43 = vld [vmem:[%s198_s0 + $0xb] sm:$0x3] }
   0xf   :  { %49 = vst [vmem:[%s199_s1 + $0x7] sm:$0x3] %v48_v37  ;;  %v53_v44 = vand.u32 2147483647, %v52_v38  ;;  %64 = vst [vmem:[%s199_s1 + $0x12] sm:$0x3] %v63_v42 }
  0x10   :  { %66 = vst [vmem:[%s199_s1 + $0x14] sm:$0x3] %v65_v43  ;;  %24 = vst [vmem:[%s199_s1] sm:$0x3] %v23_v41 }
  0x11   :  { %54 = vst [vmem:[%s199_s1 + $0x9] sm:$0x3] %v53_v44 }

</bundles_post_ra>
